<compile_context>
chip_gen: v7x
topology: tpu7x:2x2x1
jax: 0.10.0
libtpu: 0.0.40
codegen_flags: <defaults>
</compile_context>

<pallas_src>
import functools

import jax
import jax.numpy as jnp
from jax.experimental import pallas as pl
from jax.experimental.pallas import tpu as pltpu


def _round_up(x: int, m: int) -> int:
    return ((x + m - 1) // m) * m


def _cdiv(a: int, b: int) -> int:
    return -(-a // b)


def mlp_kernel(x_ref, w1_ref, b1_ref, w2_ref, b2_ref, o_ref, acc_ref, *,
               mxu_dtype):
    """One (batch-tile, hidden-tile) step of the fused MLP."""
    hk = pl.program_id(1)

    @pl.when(hk == 0)
    def _():
        acc_ref[...] = jnp.zeros_like(acc_ref)

    # Layer 1 on this hidden chunk: [TB, D_in_p] @ [D_in_p, TH] (MXU, f32 acc).
    # x arrives in f32; cast to the MXU operand dtype in-kernel (hides under
    # MXU slack, avoids an extra HBM pass in the wrapper).
    xb = x_ref[...].astype(mxu_dtype)
    h = jnp.dot(xb, w1_ref[...], preferred_element_type=jnp.float32)
    h = jnp.maximum(h + b1_ref[...], 0.0)               # bias + ReLU in f32

    # Layer 2 partial product for this hidden chunk, accumulated in f32.
    acc_ref[...] += jnp.dot(h.astype(mxu_dtype), w2_ref[...],
                            preferred_element_type=jnp.float32)

    @pl.when(hk == pl.num_programs(1) - 1)
    def _():
        y = acc_ref[...] + b2_ref[...]
        # sigmoid(y) = 0.5 * tanh(0.5 * y) + 0.5 : single EUP op, exact math.
        y = 0.5 * jnp.tanh(0.5 * y) + 0.5
        o_ref[...] = y.astype(o_ref.dtype)


def mlp_forward(x, w1, b1, w2, b2, *, block_b: int = 256, block_h: int = 512,
                mxu_dtype=jnp.bfloat16, out_dtype=None):
    """Fused MLP forward.

    x: [B, D_in], w1: [D_in, H], b1: [H], w2: [H, D_out], b2: [D_out].
    Weights are stored pre-transposed ([in, out]) so the kernel does plain
    row-major matmuls.  `mxu_dtype` controls the matmul operand dtype
    (bf16 recommended; pass jnp.float32 for exact f32 math).
    """
    B, D_in = x.shape
    H = w1.shape[1]
    D_out = w2.shape[1]
    out_dtype = x.dtype if out_dtype is None else out_dtype

    # ---- tile / padding selection -----------------------------------------
    # Lane alignment: every feature dim padded to a multiple of 128.
    D_in_p = _round_up(D_in, 128)
    D_out_p = _round_up(D_out, 128)

    # Hidden (contraction) tiling: pick TH so the H grid divides evenly.
    H_128 = _round_up(H, 128)
    num_h = max(1, _cdiv(H_128, block_h))
    TH = _round_up(_cdiv(H_128, num_h), 128)
    H_p = TH * num_h

    # Batch tiling: balanced so padding never approaches a full tile.
    n_b = max(1, _cdiv(B, block_b))
    TB = _round_up(_cdiv(B, n_b), 8)
    B_p = _round_up(B, TB)
    num_b = B_p // TB
    # v7x has 2 TensorCores: make sure the "parallel" axis has >= 2 steps.
    if num_b < 2 and TB >= 16:
        TB = _round_up(TB // 2, 8)
        B_p = _round_up(B, TB)
        num_b = B_p // TB

    # ---- padding (zero-pad is mathematically exact, see header) -----------
    x_p = jnp.pad(x, ((0, B_p - B), (0, D_in_p - D_in))).astype(jnp.float32)
    w1_p = jnp.pad(w1, ((0, D_in_p - D_in), (0, H_p - H))).astype(mxu_dtype)
    b1_p = jnp.pad(b1.reshape(1, H), ((0, 0), (0, H_p - H))).astype(jnp.float32)
    w2_p = jnp.pad(w2, ((0, H_p - H), (0, D_out_p - D_out))).astype(mxu_dtype)
    b2_p = jnp.pad(b2.reshape(1, D_out),
                   ((0, 0), (0, D_out_p - D_out))).astype(jnp.float32)

    grid = (num_b, num_h)
    weights_resident = (num_h == 1)   # constant block index across whole grid

    def _spec(shape, index_map, *, single_buffer=False):
        if single_buffer:
            # Constant index_map -> no re-DMA; Buffered(1) drops the unused
            # second pipeline buffer and halves the resident VMEM cost.
            return pl.BlockSpec(shape, index_map,
                                pipeline_mode=pl.Buffered(1))
        return pl.BlockSpec(shape, index_map)

    # ---- VMEM budget -------------------------------------------------------
    mxu_bytes = jnp.dtype(mxu_dtype).itemsize
    out_bytes = jnp.dtype(out_dtype).itemsize
    nbuf_w = 1 if weights_resident else 2
    nbuf_x = 1 if num_b == 1 else 2
    vmem_needed = (
        nbuf_x * TB * D_in_p * 4            # x blocks (f32)
        + nbuf_w * D_in_p * TH * mxu_bytes  # w1 blocks
        + nbuf_w * TH * 4                   # b1 blocks
        + nbuf_w * TH * D_out_p * mxu_bytes # w2 blocks
        + 1 * D_out_p * 4                   # b2 (single-buffered)
        + 2 * TB * D_out_p * out_bytes      # out blocks
        + TB * D_out_p * 4                  # f32 accumulator scratch
        + TB * TH * (4 + mxu_bytes)         # hidden h (f32) + its MXU cast
    )
    vmem_limit = min(int(vmem_needed * 1.5) + (8 << 20), 96 << 20)

    # ---- cost estimate ------------------------------------------------------
    flops = 2 * B_p * (D_in_p * H_p + H_p * D_out_p)
    bytes_accessed = (
        x_p.size * 4
        + w1_p.size * mxu_bytes + w2_p.size * mxu_bytes
        + b1_p.size * 4 + b2_p.size * 4
        + B_p * D_out_p * out_bytes
    )

    kernel = functools.partial(mlp_kernel, mxu_dtype=mxu_dtype)

    out_p = pl.pallas_call(
        kernel,
        out_shape=jax.ShapeDtypeStruct((B_p, D_out_p), out_dtype),
        grid_spec=pl.GridSpec(
            grid=grid,
            in_specs=[
                # x: tiled over batch, constant across the H axis.
                _spec((TB, D_in_p), lambda i, k: (i, 0),
                      single_buffer=(num_b == 1)),
                # w1 / b1: column block of the hidden dim.
                _spec((D_in_p, TH), lambda i, k: (0, k),
                      single_buffer=weights_resident),
                _spec((1, TH), lambda i, k: (0, k),
                      single_buffer=weights_resident),
                # w2: row block of the hidden dim.
                _spec((TH, D_out_p), lambda i, k: (k, 0),
                      single_buffer=weights_resident),
                # b2: fully resident.
                _spec((1, D_out_p), lambda i, k: (0, 0), single_buffer=True),
            ],
            out_specs=pl.BlockSpec((TB, D_out_p), lambda i, k: (i, 0)),
            scratch_shapes=[pltpu.VMEM((TB, D_out_p), jnp.float32)],
        ),
        compiler_params=pltpu.CompilerParams(
            # Batch steps are independent (megacore on v7x); H is a reduction.
            dimension_semantics=("parallel", "arbitrary"),
            vmem_limit_bytes=vmem_limit,
        ),
        cost_estimate=pl.CostEstimate(
            flops=flops,
            transcendentals=B_p * D_out_p,      # one tanh per output element
            bytes_accessed=bytes_accessed,
        ),
    )(x_p, w1_p, b1_p, w2_p, b2_p)

    # Strip batch / feature padding.
    return out_p[:B, :D_out]


def mlp_reference_exact(x, w1, b1, w2, b2):
    h = jnp.maximum(x @ w1 + b1, 0.0)
    return jax.nn.sigmoid(h @ w2 + b2)


def mlp_reference_matched(x, w1, b1, w2, b2, mxu_dtype):
    """Reference doing the same dtype casts as the kernel's MXU path."""
    f32 = jnp.float32
    xd = x.astype(mxu_dtype).astype(f32)
    w1d = w1.astype(mxu_dtype).astype(f32)
    w2d = w2.astype(mxu_dtype).astype(f32)
    h = jnp.maximum(xd @ w1d + b1, 0.0)
    y = h.astype(mxu_dtype).astype(f32) @ w2d + b2
    return jax.nn.sigmoid(y)


if __name__ == "__main__":
    # Small shapes consistent with MLP(layers=(D_in, H, D_out)).
    B, D_in, H, D_out = 8, 32, 64, 16

    key = jax.random.PRNGKey(0)
    kx, kw1, kb1, kw2, kb2 = jax.random.split(key, 5)

    x = jax.random.normal(kx, (B, D_in), dtype=jnp.float32)

    # PyTorch-style nn.Linear init: U(-1/sqrt(fan_in), 1/sqrt(fan_in)).
    bound1 = 1.0 / jnp.sqrt(D_in)
    w1 = jax.random.uniform(kw1, (D_in, H), jnp.float32, -bound1, bound1)
    b1 = jax.random.uniform(kb1, (H,), jnp.float32, -bound1, bound1)
    bound2 = 1.0 / jnp.sqrt(H)
    w2 = jax.random.uniform(kw2, (H, D_out), jnp.float32, -bound2, bound2)
    b2 = jax.random.uniform(kb2, (D_out,), jnp.float32, -bound2, bound2)

    out = mlp_forward(x, w1, b1, w2, b2)
    jax.block_until_ready(out)
    assert out.shape == (B, D_out)

    # Check against a reference applying the same bf16 casts at the MXU inputs
    # (isolates kernel-structure errors from expected bf16 rounding).
    ref_matched = mlp_reference_matched(x, w1, b1, w2, b2, jnp.bfloat16)
    assert jnp.allclose(out, ref_matched, atol=2e-3, rtol=0), (
        float(jnp.max(jnp.abs(out - ref_matched))))

    # Looser sanity check against the exact f32 reference (bf16 operand
    # rounding is now the only difference; sigmoid is exact via tanh).
    ref_exact = mlp_reference_exact(x, w1, b1, w2, b2)
    assert jnp.allclose(out, ref_exact, atol=2e-2, rtol=0), (
        float(jnp.max(jnp.abs(out - ref_exact))))

    print("KERNEL_OK")
</pallas_src>

<mosaic_0001>
module attributes {stable_mosaic.version = 11 : i64} {
  func.func @mlp_kernel(%arg0: i32, %arg1: i32, %arg2: memref<8x128xf32, #tpu.memory_space<vmem>>, %arg3: memref<128x128xbf16, #tpu.memory_space<vmem>>, %arg4: memref<1x128xf32, #tpu.memory_space<vmem>>, %arg5: memref<128x128xbf16, #tpu.memory_space<vmem>>, %arg6: memref<1x128xf32, #tpu.memory_space<vmem>>, %arg7: memref<8x128xf32, #tpu.memory_space<vmem>>, %arg8: memref<8x128xf32, #tpu.memory_space<vmem>>) attributes {dimension_semantics = [#tpu.dimension_semantics<parallel>, #tpu.dimension_semantics<arbitrary>], iteration_bounds = array<i64: 1, 1>, scalar_prefetch = 0 : i64, scratch_operands = 1 : i64, tpu.core_type = #tpu.core_type<tc>, window_params = [{pipeline_mode = #tpu.pipeline_mode<synchronous>, transform_indices = @transform_0, window_bounds = array<i64: 8, 128>}, {pipeline_mode = #tpu.pipeline_mode<synchronous>, transform_indices = @transform_1, window_bounds = array<i64: 128, 128>}, {pipeline_mode = #tpu.pipeline_mode<synchronous>, transform_indices = @transform_2, window_bounds = array<i64: 1, 128>}, {pipeline_mode = #tpu.pipeline_mode<synchronous>, transform_indices = @transform_3, window_bounds = array<i64: 128, 128>}, {pipeline_mode = #tpu.pipeline_mode<synchronous>, transform_indices = @transform_4, window_bounds = array<i64: 1, 128>}, {transform_indices = @transform_5, window_bounds = array<i64: 8, 128>}]} {
    %c0_i32 = arith.constant 0 : i32
    %0 = arith.cmpi eq, %arg1, %c0_i32 : i32
    %1 = arith.extui %0 : i1 to i32
    %c0_i32_0 = arith.constant 0 : i32
    %2 = arith.cmpi ne, %1, %c0_i32_0 : i32
    scf.if %2 {
      %cst_16 = arith.constant 0.000000e+00 : f32
      %21 = vector.broadcast %cst_16 : f32 to vector<8x128xf32>
      %c0_17 = arith.constant 0 : index
      %c0_18 = arith.constant 0 : index
      %22 = vector.load %arg8[%c0_17, %c0_18] : memref<8x128xf32, #tpu.memory_space<vmem>>, vector<8x128xf32>
      tpu.vector_store %arg8[%c0_17, %c0_18], %21 {strides = array<i32>} : memref<8x128xf32, #tpu.memory_space<vmem>>, vector<8x128xf32>,
    } else {
    }
    %c0 = arith.constant 0 : index
    %c0_1 = arith.constant 0 : index
    %3 = vector.load %arg2[%c0, %c0_1] : memref<8x128xf32, #tpu.memory_space<vmem>>, vector<8x128xf32>
    %4 = arith.truncf %3 : vector<8x128xf32> to vector<8x128xbf16>
    %c0_2 = arith.constant 0 : index
    %c0_3 = arith.constant 0 : index
    %5 = vector.load %arg3[%c0_2, %c0_3] : memref<128x128xbf16, #tpu.memory_space<vmem>>, vector<128x128xbf16>
    %cst = arith.constant dense<0.000000e+00> : vector<8x128xf32>
    %6 = tpu.matmul %4, %5, %cst {dimension_numbers = #tpu.dot_dimension_numbers<[1], [0], [0], [1], [0, 0, 1, 1], [], []>} : vector<8x128xbf16>, vector<128x128xbf16>, vector<8x128xf32> -> vector<8x128xf32>
    %c0_4 = arith.constant 0 : index
    %c0_5 = arith.constant 0 : index
    %7 = vector.load %arg4[%c0_4, %c0_5] : memref<1x128xf32, #tpu.memory_space<vmem>>, vector<1x128xf32>
    %8 = vector.broadcast %7 : vector<1x128xf32> to vector<8x128xf32>
    %9 = arith.addf %6, %8 : vector<8x128xf32>
    %cst_6 = arith.constant 0.000000e+00 : f32
    %10 = vector.broadcast %cst_6 : f32 to vector<8x128xf32>
    %11 = arith.maximumf %9, %10 : vector<8x128xf32>
    %c0_7 = arith.constant 0 : index
    %c0_8 = arith.constant 0 : index
    %12 = vector.load %arg8[%c0_7, %c0_8] : memref<8x128xf32, #tpu.memory_space<vmem>>, vector<8x128xf32>
    %13 = arith.truncf %11 : vector<8x128xf32> to vector<8x128xbf16>
    %c0_9 = arith.constant 0 : index
    %c0_10 = arith.constant 0 : index
    %14 = vector.load %arg5[%c0_9, %c0_10] : memref<128x128xbf16, #tpu.memory_space<vmem>>, vector<128x128xbf16>
    %cst_11 = arith.constant dense<0.000000e+00> : vector<8x128xf32>
    %15 = tpu.matmul %13, %14, %cst_11 {dimension_numbers = #tpu.dot_dimension_numbers<[1], [0], [0], [1], [0, 0, 1, 1], [], []>} : vector<8x128xbf16>, vector<128x128xbf16>, vector<8x128xf32> -> vector<8x128xf32>
    %16 = arith.addf %12, %15 : vector<8x128xf32>
    %c0_12 = arith.constant 0 : index
    %c0_13 = arith.constant 0 : index
    %17 = vector.load %arg8[%c0_12, %c0_13] : memref<8x128xf32, #tpu.memory_space<vmem>>, vector<8x128xf32>
    tpu.vector_store %arg8[%c0_12, %c0_13], %16 {strides = array<i32>} : memref<8x128xf32, #tpu.memory_space<vmem>>, vector<8x128xf32>,
    %c0_i32_14 = arith.constant 0 : i32
    %18 = arith.cmpi eq, %arg1, %c0_i32_14 : i32
    %19 = arith.extui %18 : i1 to i32
    %c0_i32_15 = arith.constant 0 : i32
    %20 = arith.cmpi ne, %19, %c0_i32_15 : i32
    scf.if %20 {
      %c0_16 = arith.constant 0 : index
      %c0_17 = arith.constant 0 : index
      %21 = vector.load %arg8[%c0_16, %c0_17] : memref<8x128xf32, #tpu.memory_space<vmem>>, vector<8x128xf32>
      %c0_18 = arith.constant 0 : index
      %c0_19 = arith.constant 0 : index
      %22 = vector.load %arg6[%c0_18, %c0_19] : memref<1x128xf32, #tpu.memory_space<vmem>>, vector<1x128xf32>
      %23 = vector.broadcast %22 : vector<1x128xf32> to vector<8x128xf32>
      %24 = arith.addf %21, %23 : vector<8x128xf32>
      %cst_20 = arith.constant 5.000000e-01 : f32
      %25 = vector.broadcast %cst_20 : f32 to vector<8x128xf32>
      %26 = arith.mulf %25, %24 : vector<8x128xf32>
      %27 = math.tanh %26 : vector<8x128xf32>
      %cst_21 = arith.constant 5.000000e-01 : f32
      %28 = vector.broadcast %cst_21 : f32 to vector<8x128xf32>
      %29 = arith.mulf %28, %27 : vector<8x128xf32>
      %cst_22 = arith.constant 5.000000e-01 : f32
      %30 = vector.broadcast %cst_22 : f32 to vector<8x128xf32>
      %31 = arith.addf %29, %30 : vector<8x128xf32>
      %c0_23 = arith.constant 0 : index
      %c0_24 = arith.constant 0 : index
      %32 = vector.load %arg7[%c0_23, %c0_24] : memref<8x128xf32, #tpu.memory_space<vmem>>, vector<8x128xf32>
      tpu.vector_store %arg7[%c0_23, %c0_24], %31 {strides = array<i32>} : memref<8x128xf32, #tpu.memory_space<vmem>>, vector<8x128xf32>,
    } else {
    }
    return
  }
  func.func @transform_0(%arg0: i32, %arg1: i32) -> (i32, i32) {
    %c0_i32 = arith.constant 0 : i32
    %c0_i32_0 = arith.constant 0 : i32
    return %arg0, %c0_i32 : i32, i32
  }
  func.func @transform_1(%arg0: i32, %arg1: i32) -> (i32, i32) {
    %c0_i32 = arith.constant 0 : i32
    %c0_i32_0 = arith.constant 0 : i32
    return %c0_i32, %arg1 : i32, i32
  }
  func.func @transform_2(%arg0: i32, %arg1: i32) -> (i32, i32) {
    %c0_i32 = arith.constant 0 : i32
    %c0_i32_0 = arith.constant 0 : i32
    return %c0_i32, %arg1 : i32, i32
  }
  func.func @transform_3(%arg0: i32, %arg1: i32) -> (i32, i32) {
    %c0_i32 = arith.constant 0 : i32
    %c0_i32_0 = arith.constant 0 : i32
    return %arg1, %c0_i32 : i32, i32
  }
  func.func @transform_4(%arg0: i32, %arg1: i32) -> (i32, i32) {
    %c0_i32 = arith.constant 0 : i32
    %c0_i32_0 = arith.constant 0 : i32
    %c0_i32_1 = arith.constant 0 : i32
    return %c0_i32, %c0_i32_0 : i32, i32
  }
  func.func @transform_5(%arg0: i32, %arg1: i32) -> (i32, i32) {
    %c0_i32 = arith.constant 0 : i32
    %c0_i32_0 = arith.constant 0 : i32
    return %arg0, %c0_i32 : i32, i32
  }
}

</mosaic_0001>

<bundles_post_ra>
// kernel: tpu_custom_call.1
= control target key start
LH: loop header
LB: loop body
LE: loop exit
PB: predicated region body
PF: predicated region fallthrough
CT: control target
= control target key end

     0   :  { %10 = vsyncpa [#allocation4], 0  ;;  %s615_s0 = inlined_call_operand.hbm [shape: f32[8,128], index: 0, kind: input, shape index: {}]   ;;  %s616_s1 = inlined_call_operand.hbm [shape: bf16[128,128], index: 1, kind: input, shape index: {}]   ;;  %s617_s2 = inlined_call_operand.vmem [shape: f32[1,128], index: 2, kind: input, shape index: {}]   ;;  %s618_s3 = inlined_call_operand.hbm [shape: bf16[128,128], index: 3, kind: input, shape index: {}]   ;;  %s619_s4 = inlined_call_operand.vmem [shape: f32[1,128], index: 4, kind: input, shape index: {}]   ;;  %s620_s5 = inlined_call_operand.hbm [shape: f32[8,128], index: 5, kind: output, shape index: {}]  }
   0x1   :  { %11 = vsyncpa [#allocation7], 0 }
   0x2   :  { %12 = vsyncpa [#allocation5], 0  ;;  %s517_s18 = smov [#allocation6]   ;;  %s423_s22 = scalar_lea.hbm %s616_s1, 1024 }
   0x3   :  { %s28_s19 = sshll.u32 %s517_s18, 4  ;;  %p424_p0 = scmp.ne.s32.totalorder %s616_s1, %s423_s22  ;;  %s29_s19 = int_to_ptr.vmem [resolvable:$true] %s28_s19 }
   0x4   :  { %p427_p1 = scmp.lt.u32.totalorder %s423_s22, %s616_s1 }
   0x6   :  { %p429_p2 = pnand %p427_p1, %p424_p0 }
   0x8   :  { %432 = shalt.err (!%p429_p2)
}
   0x9   :  { %s433_s27 = scalar_lea.vmem %s29_s19, 1024  ;;  %p438_p4 = scmp.lt.s32.totalorder %s29_s19, %s29_s19 }
   0xa   :  { %p434_p3 = scmp.ne.s32.totalorder %s29_s19, %s433_s27  ;;  %p439_p5 = scmp.lt.s32.totalorder %s433_s27, %s433_s27 }
   0xc   :  { %p440_p6 = por %p439_p5, %p438_p4 }
   0xe   :  { %p441_p7 = pnand %p440_p6, %p434_p3 }
  0x10   :  { %444 = shalt.err (!%p441_p7)
}
  0x11   :  { %s518_s28 = smov 64   ;;  %s519_s29 = smov 4  }
  0x12   :  { %34 = dma.hbm_to_vmem [thread:$0]  %s616_s1, 1024, %s29_s19, [#allocation7], %s518_s28, %s518_s28, %s519_s29  }
  0x13   :  { %s520_s7 = smov [#allocation3]   ;;  %s521_s9 = smov [#allocation8]  }
  0x14   :  { %s19_s8 = sshll.u32 %s520_s7, 4  ;;  %s42_s10 = sshll.u32 %s521_s9, 4  ;;  %s20_s8 = int_to_ptr.vmem [resolvable:$true] %s19_s8  ;;  %s43_s10 = int_to_ptr.vmem [resolvable:$true] %s42_s10 }
  0x15   :  { %s445_s13 = scalar_lea.hbm %s615_s0, 128 }
  0x16   :  { %p446_p8 = scmp.ne.s32.totalorder %s615_s0, %s445_s13  ;;  %p449_p9 = scmp.lt.u32.totalorder %s445_s13, %s615_s0 }
  0x18   :  { %p451_p10 = pnand %p449_p9, %p446_p8 }
  0x1a   :  { %454 = shalt.err (!%p451_p10)
}
  0x1b   :  { %s455_s1 = scalar_lea.vmem %s20_s8, 128  ;;  %p460_p12 = scmp.lt.s32.totalorder %s20_s8, %s20_s8 }
  0x1c   :  { %p456_p11 = scmp.ne.s32.totalorder %s20_s8, %s455_s1  ;;  %p461_p13 = scmp.lt.s32.totalorder %s455_s1, %s455_s1 }
  0x1e   :  { %p462_p0 = por %p461_p13, %p460_p12 }
  0x20   :  { %p463_p1 = pnand %p462_p0, %p456_p11 }
  0x22   :  { %466 = shalt.err (!%p463_p1)
}
  0x23   :  { %22 = dma.hbm_to_vmem [thread:$0]  %s615_s0, 128, %s20_s8, [#allocation4]  }
  0x24   :  { %s467_s22 = scalar_lea.hbm %s618_s3, 1024 }
  0x25   :  { %p468_p2 = scmp.ne.s32.totalorder %s618_s3, %s467_s22  ;;  %p471_p3 = scmp.lt.u32.totalorder %s467_s22, %s618_s3 }
  0x27   :  { %p473_p4 = pnand %p471_p3, %p468_p2 }
  0x29   :  { %476 = shalt.err (!%p473_p4)
}
  0x2a   :  { %s477_s27 = scalar_lea.vmem %s43_s10, 1024  ;;  %p482_p6 = scmp.lt.s32.totalorder %s43_s10, %s43_s10 }
  0x2b   :  { %p478_p5 = scmp.ne.s32.totalorder %s43_s10, %s477_s27  ;;  %p483_p7 = scmp.lt.s32.totalorder %s477_s27, %s477_s27 }
  0x2d   :  { %p484_p8 = por %p483_p7, %p482_p6 }
  0x2f   :  { %p485_p9 = pnand %p484_p8, %p478_p5 }
  0x31   :  { %488 = shalt.err (!%p485_p9)
}
  0x32   :  { %48 = dma.hbm_to_vmem [thread:$0]  %s618_s3, 1024, %s43_s10, [#allocation7], %s518_s28, %s518_s28, %s519_s29  }
  0x33   :  { %511 = dma.done.wait [#allocation4], 128  }
  0x34   :  { %512 = vsyncadd [#allocation4], 4294967168 }
  0x35   :  { %513 = dma.done.wait [#allocation7], 2048  }
  0x36   :  { %514 = vsyncadd [#allocation7], 4294965248  ;;  %v522_v0 = vmov 0.0   ;;  %vm523_vm0 = vmmov 0   ;;  %v405_v1 = vld [vmem:[#allocation6] sm:$0xff]   ;;  %v406_v2 = vld [vmem:[#allocation6 + $0x8] sm:$0xff]  }
  0x37   :  { %357 = vmatprep.subr.bf16.mxu0 %v522_v0  ;;  %373 = vmatprep.mubr.msk.bf16.mxu0 %vm523_vm0, %v522_v0  ;;  %v407_v3 = vld [vmem:[#allocation6 + $0x10] sm:$0xff]   ;;  %v413_v4 = vld [vmem:[#allocation8] sm:$0xff]   ;;  %v408_v5 = vld [vmem:[#allocation6 + $0x18] sm:$0xff]  }
  0x38   :  { %377 = vmatprep.subr.bf16.mxu1 %v522_v0  ;;  %393 = vmatprep.mubr.msk.bf16.mxu1 %vm523_vm0, %v522_v0  ;;  %v414_v6 = vld [vmem:[#allocation8 + $0x8] sm:$0xff]   ;;  %v409_v7 = vld [vmem:[#allocation6 + $0x20] sm:$0xff]   ;;  %v415_v8 = vld [vmem:[#allocation8 + $0x10] sm:$0xff]  }
  0x39   :  { %358 = vmatpush3.bf16.msra.mxu0 %v405_v1  ;;  %378 = vmatpush3.bf16.msra.mxu1 %v413_v4  ;;  %v410_v9 = vld [vmem:[#allocation6 + $0x28] sm:$0xff]   ;;  %v416_v10 = vld [vmem:[#allocation8 + $0x18] sm:$0xff]   ;;  %v411_v11 = vld [vmem:[#allocation6 + $0x30] sm:$0xff]  }
  0x3a   :  { %359 = vmatprep.subr.bf16.mxu0 %v522_v0  ;;  %379 = vmatprep.subr.bf16.mxu1 %v522_v0  ;;  %v417_v12 = vld [vmem:[#allocation8 + $0x20] sm:$0xff]   ;;  %v412_v13 = vld [vmem:[#allocation6 + $0x38] sm:$0xff]   ;;  %v418_v15 = vld [vmem:[#allocation8 + $0x28] sm:$0xff]  }
  0x3b   :  { %v66_v14 = vld [vmem:[#allocation3] sm:$0xff]  ;;  %v419_v17 = vld [vmem:[#allocation8 + $0x30] sm:$0xff]  }
  0x3c   :  { %v67_v16 = vpack.c.bf16 %v66_v14, %v66_v14  ;;  %v420_v18 = vld [vmem:[#allocation8 + $0x38] sm:$0xff]  }
  0x3d   :  { %360 = vmatpush3.bf16.msra.mxu0 %v406_v2  ;;  %380 = vmatpush3.bf16.msra.mxu1 %v414_v6  ;;  %v321_v19 = vld [vmem:[%s617_s2] ss:$0 sm:$0xff]  ;;  %s524_s2 = smov [#allocation9]  }
  0x3e   :  { %361 = vmatprep.subr.bf16.mxu0 %v522_v0  ;;  %381 = vmatprep.subr.bf16.mxu1 %v522_v0  ;;  %v338_v27 = vld [vmem:[%s619_s4] ss:$0 sm:$0xff]  ;;  %s311_s7 = sshll.u32 %s524_s2, 4  ;;  %s312_s7 = int_to_ptr.vmem [resolvable:$true] %s311_s7 }
  0x3f   :  { %s489_s8 = scalar_lea.vmem %s312_s7, 128  ;;  %p494_p11 = scmp.lt.s32.totalorder %s312_s7, %s312_s7 }
  0x40   :  { %p490_p10 = scmp.ne.s32.totalorder %s312_s7, %s489_s8  ;;  %p495_p12 = scmp.lt.s32.totalorder %s489_s8, %s489_s8 }
  0x41   :  { %362 = vmatpush3.bf16.msra.mxu0 %v407_v3  ;;  %382 = vmatpush3.bf16.msra.mxu1 %v415_v8 }
  0x42   :  { %363 = vmatprep.subr.bf16.mxu0 %v522_v0  ;;  %383 = vmatprep.subr.bf16.mxu1 %v522_v0  ;;  %p496_p13 = por %p495_p12, %p494_p11 }
  0x44   :  { %p497_p0 = pnand %p496_p13, %p490_p10 }
  0x45   :  { %364 = vmatpush3.bf16.msra.mxu0 %v408_v5  ;;  %384 = vmatpush3.bf16.msra.mxu1 %v416_v10 }
  0x46   :  { %365 = vmatprep.subr.bf16.mxu0 %v522_v0  ;;  %385 = vmatprep.subr.bf16.mxu1 %v522_v0 }
  0x49   :  { %366 = vmatpush3.bf16.msra.mxu0 %v409_v7  ;;  %386 = vmatpush3.bf16.msra.mxu1 %v417_v12 }
  0x4a   :  { %367 = vmatprep.subr.bf16.mxu0 %v522_v0  ;;  %387 = vmatprep.subr.bf16.mxu1 %v522_v0 }
  0x4d   :  { %368 = vmatpush3.bf16.msra.mxu0 %v410_v9  ;;  %388 = vmatpush3.bf16.msra.mxu1 %v418_v15 }
  0x4e   :  { %369 = vmatprep.subr.bf16.mxu0 %v522_v0  ;;  %389 = vmatprep.subr.bf16.mxu1 %v522_v0 }
  0x51   :  { %370 = vmatpush3.bf16.msra.mxu0 %v411_v11  ;;  %390 = vmatpush3.bf16.msra.mxu1 %v419_v17 }
  0x52   :  { %371 = vmatprep.subr.bf16.mxu0 %v522_v0  ;;  %391 = vmatprep.subr.bf16.mxu1 %v522_v0 }
  0x55   :  { %372 = vmatpush3.bf16.msra.mxu0 %v412_v13  ;;  %392 = vmatpush3.bf16.msra.mxu1 %v420_v18 }
  0x58   :  { %374 = vmatmul.mubr.bf16.vlgmr.msra.gmra.mrb[0].mxu0 %v67_v16 }
 0x12b   :  { %v173_v20 = vpop.f32.mrb[0].mxu0 }
 0x12c   :  { %v174_v21 = vadd.f32 %v321_v19, %v173_v20  ;;  %v375_v22 = vpop.f32.mrb[1].mxu0 }
 0x12d   :  { %v176_v23 = vpop.f32.mrb[2].mxu0 }
 0x12e   :  { %v179_v24 = vmax.f32 %v174_v21, 0.0  ;;  %v376_v25 = vpop.f32.mrb[3].mxu0 }
 0x130   :  { %v181_v26 = vpack.c.bf16 %v179_v24, %v179_v24 }
 0x132   :  { %394 = vmatmul.mubr.bf16.vlgmr.msra.gmra.mrb[0].mxu1 %v181_v26 }
 0x205   :  { %v280_v28 = vpop.f32.mrb[0].mxu1 }
 0x206   :  { %v299_v29 = vadd.f32 %v338_v27, %v280_v28  ;;  %v395_v30 = vpop.f32.mrb[1].mxu1 }
 0x207   :  { %v283_v31 = vpop.f32.mrb[2].mxu1 }
 0x208   :  { %v300_v32 = vmul.f32 0.5, %v299_v29  ;;  %v396_v33 = vpop.f32.mrb[3].mxu1 }
 0x20a   :  { %421 = vtanh.f32 %v300_v32 }
 0x214   :  { %v422_v34 = vpop.eup %421 }
 0x215   :  { %v302_v35 = vmul.f32 0.5, %v422_v34 }
 0x217   :  { %v303_v36 = vadd.f32 0.5, %v302_v35 }
 0x219   :  { %304 = vst [vmem:[#allocation9] sm:$0xff] %v303_v36 }
 0x21a   :  { %500 = shalt.err (!%p497_p0)
}
 0x21b   :  { %s501_s10 = scalar_lea.hbm %s620_s5, 128 }
 0x21c   :  { %p502_p1 = scmp.ne.s32.totalorder %s620_s5, %s501_s10  ;;  %p505_p2 = scmp.lt.u32.totalorder %s501_s10, %s620_s5 }
 0x21e   :  { %p507_p3 = pnand %p505_p2, %p502_p1 }
 0x220   :  { %510 = shalt.err (!%p507_p3)
}
 0x221   :  { %314 = dma.vmem_to_hbm [thread:$0]  %s312_s7, 128, %s620_s5, [#allocation5]  }
 0x222   :  { %515 = dma.done.wait [#allocation5], 128  }
 0x223   :  { %516 = vsyncadd [#allocation5], 4294967168 }
 0x224   :  { %318 = vsyncpa [#allocation4], 1 }
 0x225   :  { %319 = vsyncpa [#allocation7], 1 }
 0x226   :  { %320 = vsyncpa [#allocation5], 1 }

</bundles_post_ra>
